<compile_context>
chip_gen: v7x
topology: tpu7x:2x2x1
jax: 0.10.0
libtpu: 0.0.40
codegen_flags: <defaults>
</compile_context>

<pallas_src>
from functools import partial

import jax
import jax.numpy as jnp
from jax.experimental import pallas as pl
from jax.experimental.pallas import tpu as pltpu


# ------------------------------ Pallas kernel --------------------------------
def _blur_kernel(x_ref, o_ref, *, w: int):
    # x_ref / o_ref: (H, N*W) lane-dense slab; planes are packed along lanes.
    x = x_ref[...].astype(jnp.float32)
    H, L = x.shape

    col = jax.lax.broadcasted_iota(jnp.int32, (H, L), 1) % w
    row = jax.lax.broadcasted_iota(jnp.int32, (H, L), 0)

    # ---- horizontal [1,2,1] pass (lane axis), reflect padding ----
    # left[l]  = x[l-1], right[l] = x[l+1] (circular).  At a plane's left edge
    # (col==0) reflect means the left neighbour equals the right neighbour;
    # at the right edge (col==W-1) it equals the left neighbour.  Those are
    # exactly the lanes where the circular roll crosses a plane boundary, so
    # the override also fixes cross-plane contamination.
    left = pltpu.roll(x, 1, axis=1)
    right = pltpu.roll(x, L - 1, axis=1)
    nsum = jnp.where(col == 0, 2.0 * right,
                     jnp.where(col == w - 1, 2.0 * left, left + right))
    y = nsum + 2.0 * x                      # unscaled (fold 1/4 into final 1/16)

    # ---- vertical [1,2,1] pass (sublane axis), reflect padding ----
    up = pltpu.roll(y, 1, axis=0)
    down = pltpu.roll(y, H - 1, axis=0)
    msum = jnp.where(row == 0, 2.0 * down,
                     jnp.where(row == H - 1, 2.0 * up, up + down))

    o_ref[...] = ((msum + 2.0 * y) * 0.0625).astype(o_ref.dtype)


def blur(x):
    """Normalized 3x3 binomial blur (reflect padding) for NCHW images."""
    B, C, H, W = x.shape
    assert H >= 2 and W >= 2, "reflect-padded 3-tap blur needs H,W >= 2"
    N = B * C
    L = N * W
    # (B,C,H,W) -> (H, N*W): put all planes on the 128-lane axis (lane-dense).
    x2 = x.reshape(N, H, W).transpose(1, 0, 2).reshape(H, L)

    out2 = pl.pallas_call(
        partial(_blur_kernel, w=W),
        out_shape=jax.ShapeDtypeStruct((H, L), x.dtype),
        grid=(1,),
        in_specs=[pl.BlockSpec((H, L), lambda i: (0, 0))],
        out_specs=pl.BlockSpec((H, L), lambda i: (0, 0)),
        compiler_params=pltpu.CompilerParams(
            dimension_semantics=("arbitrary",)),
    )(x2)

    return out2.reshape(H, N, W).transpose(1, 0, 2).reshape(B, C, H, W)


class Blur:
    """Pallas TPU port of aggan_pytorch.Blur."""

    def __call__(self, x):
        return blur(x)


# ------------------------------ JAX reference ---------------------------------
def blur_ref(x):
    """Pure-JAX reference: separable [1,2,1]/4 blur with reflect padding
    (identical to filter2D(x, outer([1,2,1],[1,2,1]), normalized=True))."""
    xp = jnp.pad(x, ((0, 0), (0, 0), (0, 0), (1, 1)), mode="reflect")
    y = (xp[..., :-2] + 2.0 * xp[..., 1:-1] + xp[..., 2:]) * 0.25
    yp = jnp.pad(y, ((0, 0), (0, 0), (1, 1), (0, 0)), mode="reflect")
    return (yp[..., :-2, :] + 2.0 * yp[..., 1:-1, :] + yp[..., 2:, :]) * 0.25


# ---------------------------------- main ---------------------------------------
if __name__ == "__main__":
    key = jax.random.PRNGKey(0)
    B, C, H, W = 2, 4, 16, 16
    x = jax.random.normal(key, (B, C, H, W), jnp.float32)

    blur_mod = Blur()
    out = jax.jit(blur_mod.__call__)(x)
    out = jax.block_until_ready(out)

    ref = jax.block_until_ready(blur_ref(x))

    assert out.shape == (B, C, H, W)
    assert bool(jnp.allclose(out, ref, rtol=1e-5, atol=1e-5)), "mismatch vs reference"
    print("KERNEL_OK")
</pallas_src>

<mosaic_0001>
module attributes {stable_mosaic.version = 11 : i64} {
  func.func @_blur_kernel(%arg0: i32, %arg1: memref<16x128xf32, #tpu.memory_space<vmem>>, %arg2: memref<16x128xf32, #tpu.memory_space<vmem>>) attributes {dimension_semantics = [#tpu.dimension_semantics<arbitrary>], iteration_bounds = array<i64: 1>, scalar_prefetch = 0 : i64, scratch_operands = 0 : i64, tpu.core_type = #tpu.core_type<tc>, window_params = [{pipeline_mode = #tpu.pipeline_mode<synchronous>, transform_indices = @transform_0, window_bounds = array<i64: 16, 128>}, {pipeline_mode = #tpu.pipeline_mode<synchronous>, transform_indices = @transform_1, window_bounds = array<i64: 16, 128>}]} {
    %c0 = arith.constant 0 : index
    %c0_0 = arith.constant 0 : index
    %0 = vector.load %arg1[%c0, %c0_0] : memref<16x128xf32, #tpu.memory_space<vmem>>, vector<16x128xf32>
    %1 = tpu.iota {dimensions = array<i32: 1>} : vector<16x128xi32>
    %c16_i32 = arith.constant 16 : i32
    %c0_i32 = arith.constant 0 : i32
    %2 = arith.cmpi eq, %c16_i32, %c0_i32 : i32
    %c1_i32 = arith.constant 1 : i32
    %3 = arith.select %2, %c1_i32, %c16_i32 : i32
    %4 = vector.broadcast %3 : i32 to vector<16x128xi32>
    %5 = arith.remsi %1, %4 : vector<16x128xi32>
    %c0_i32_1 = arith.constant 0 : i32
    %6 = vector.broadcast %c0_i32_1 : i32 to vector<16x128xi32>
    %7 = arith.cmpi ne, %5, %6 : vector<16x128xi32>
    %c0_i32_2 = arith.constant 0 : i32
    %8 = vector.broadcast %c0_i32_2 : i32 to vector<16x128xi32>
    %9 = arith.cmpi slt, %5, %8 : vector<16x128xi32>
    %c0_i32_3 = arith.constant 0 : i32
    %10 = arith.cmpi slt, %3, %c0_i32_3 : i32
    %11 = vector.broadcast %10 : i1 to vector<16x128xi1>
    %12 = vector.broadcast %11 : vector<16x128xi1> to vector<16x128xi1>
    %13 = arith.xori %9, %12 : vector<16x128xi1>
    %14 = arith.andi %13, %7 : vector<16x128xi1>
    %15 = vector.broadcast %3 : i32 to vector<16x128xi32>
    %16 = arith.addi %5, %15 : vector<16x128xi32>
    %17 = arith.select %14, %16, %5 : vector<16x128xi1>, vector<16x128xi32>
    %18 = tpu.iota {dimensions = array<i32: 0>} : vector<16x128xi32>
    %c1_i32_4 = arith.constant 1 : i32
    %19 = tpu.dynamic_rotate %0 by %c1_i32_4 dim 1 : vector<16x128xf32>, i32 -> vector<16x128xf32>
    %c127_i32 = arith.constant 127 : i32
    %20 = tpu.dynamic_rotate %0 by %c127_i32 dim 1 : vector<16x128xf32>, i32 -> vector<16x128xf32>
    %c0_i32_5 = arith.constant 0 : i32
    %21 = vector.broadcast %c0_i32_5 : i32 to vector<16x128xi32>
    %22 = arith.cmpi eq, %17, %21 : vector<16x128xi32>
    %cst = arith.constant 2.000000e+00 : f32
    %23 = vector.broadcast %cst : f32 to vector<16x128xf32>
    %24 = arith.mulf %23, %20 : vector<16x128xf32>
    %c15_i32 = arith.constant 15 : i32
    %25 = vector.broadcast %c15_i32 : i32 to vector<16x128xi32>
    %26 = arith.cmpi eq, %17, %25 : vector<16x128xi32>
    %cst_6 = arith.constant 2.000000e+00 : f32
    %27 = vector.broadcast %cst_6 : f32 to vector<16x128xf32>
    %28 = arith.mulf %27, %19 : vector<16x128xf32>
    %29 = arith.addf %19, %20 : vector<16x128xf32>
    %30 = arith.select %26, %28, %29 : vector<16x128xi1>, vector<16x128xf32>
    %31 = arith.select %22, %24, %30 : vector<16x128xi1>, vector<16x128xf32>
    %cst_7 = arith.constant 2.000000e+00 : f32
    %32 = vector.broadcast %cst_7 : f32 to vector<16x128xf32>
    %33 = arith.mulf %32, %0 : vector<16x128xf32>
    %34 = arith.addf %31, %33 : vector<16x128xf32>
    %c1_i32_8 = arith.constant 1 : i32
    %35 = tpu.dynamic_rotate %34 by %c1_i32_8 dim 0 : vector<16x128xf32>, i32 -> vector<16x128xf32>
    %c15_i32_9 = arith.constant 15 : i32
    %36 = tpu.dynamic_rotate %34 by %c15_i32_9 dim 0 : vector<16x128xf32>, i32 -> vector<16x128xf32>
    %c0_i32_10 = arith.constant 0 : i32
    %37 = vector.broadcast %c0_i32_10 : i32 to vector<16x128xi32>
    %38 = arith.cmpi eq, %18, %37 : vector<16x128xi32>
    %cst_11 = arith.constant 2.000000e+00 : f32
    %39 = vector.broadcast %cst_11 : f32 to vector<16x128xf32>
    %40 = arith.mulf %39, %36 : vector<16x128xf32>
    %c15_i32_12 = arith.constant 15 : i32
    %41 = vector.broadcast %c15_i32_12 : i32 to vector<16x128xi32>
    %42 = arith.cmpi eq, %18, %41 : vector<16x128xi32>
    %cst_13 = arith.constant 2.000000e+00 : f32
    %43 = vector.broadcast %cst_13 : f32 to vector<16x128xf32>
    %44 = arith.mulf %43, %35 : vector<16x128xf32>
    %45 = arith.addf %35, %36 : vector<16x128xf32>
    %46 = arith.select %42, %44, %45 : vector<16x128xi1>, vector<16x128xf32>
    %47 = arith.select %38, %40, %46 : vector<16x128xi1>, vector<16x128xf32>
    %cst_14 = arith.constant 2.000000e+00 : f32
    %48 = vector.broadcast %cst_14 : f32 to vector<16x128xf32>
    %49 = arith.mulf %48, %34 : vector<16x128xf32>
    %50 = arith.addf %47, %49 : vector<16x128xf32>
    %cst_15 = arith.constant 6.250000e-02 : f32
    %51 = vector.broadcast %cst_15 : f32 to vector<16x128xf32>
    %52 = arith.mulf %50, %51 : vector<16x128xf32>
    %c0_16 = arith.constant 0 : index
    %c0_17 = arith.constant 0 : index
    %53 = vector.load %arg2[%c0_16, %c0_17] : memref<16x128xf32, #tpu.memory_space<vmem>>, vector<16x128xf32>
    tpu.vector_store %arg2[%c0_16, %c0_17], %52 {strides = array<i32>} : memref<16x128xf32, #tpu.memory_space<vmem>>, vector<16x128xf32>,
    return
  }
  func.func @transform_0(%arg0: i32) -> (i32, i32) {
    %c0_i32 = arith.constant 0 : i32
    %c0_i32_0 = arith.constant 0 : i32
    %c0_i32_1 = arith.constant 0 : i32
    return %c0_i32, %c0_i32_0 : i32, i32
  }
  func.func @transform_1(%arg0: i32) -> (i32, i32) {
    %c0_i32 = arith.constant 0 : i32
    %c0_i32_0 = arith.constant 0 : i32
    %c0_i32_1 = arith.constant 0 : i32
    return %c0_i32, %c0_i32_0 : i32, i32
  }
}

</mosaic_0001>

<bundles_post_ra>
// kernel: a_call__.1
= control target key start
LH: loop header
LB: loop body
LE: loop exit
PB: predicated region body
PF: predicated region fallthrough
CT: control target
= control target key end

     0   :  { %s89_s8 = smov 127   ;;  %s90_s9 = smov 1   ;;  %v10_v2 = vlaneseq  ;;  %s129_s0 = inlined_call_operand.vmem [shape: f32[16,128], index: 0, kind: input, shape index: {}]   ;;  %s130_s1 = inlined_call_operand.vmem [shape: f32[16,128], index: 1, kind: output, shape index: {}]  }
   0x1   :  { %v8_v0 = vld [vmem:[%s129_s0] sm:$0xff]  ;;  %v9_v1 = vld [vmem:[%s129_s0 + $0x8] sm:$0xff] }
   0x2   :  { %31 = vrot.lane.b32.xlu1 %v8_v0, %s89_s8  ;;  %27 = vrot.lane.b32.xlu0 %v8_v0, %s90_s9  ;;  %v11_v3 = vand.u32 127, %v10_v2  ;;  %v47_v12 = vmul.f32 2.0, %v8_v0  ;;  %v25_v14 = vshrl.u32 %v10_v2, 7  ;;  %v48_v18 = vmul.f32 2.0, %v9_v1 }
   0x4   :  { %v16_v4 = vand.u32 15, %v11_v3  ;;  %v26_v24 = vadd.s32 8, %v25_v14  ;;  %vm53_vm2 = vcmp.lt.s32.totalorder %v25_v14, 1  ;;  %vm58_vm3 = vcmp.lt.s32.totalorder %v25_v14, 7 }
   0x5   :  { %vm61_vm4 = vcmp.eq.s32.totalorder %v25_v14, 0 }
   0x6   :  { %33 = vrot.lane.b32.xlu1 %v9_v1, %s89_s8  ;;  %29 = vrot.lane.b32.xlu0 %v9_v1, %s90_s9  ;;  %vm107_vm0 = vcmp.eq.s32.totalorder %v16_v4, 15  ;;  %vm111_vm1 = vcmp.eq.s32.totalorder %v16_v4, 0  ;;  %vm66_vm5 = vcmp.eq.s32.totalorder %v26_v24, 15 }
  0x74   :  { %v32_v5 = vpop.permute.xlu1 %31  ;;  %v28_v7 = vpop.permute.xlu0 %27 }
  0x75   :  { %v36_v8 = vmul.f32 2.0, %v32_v5  ;;  %v39_v10 = vmul.f32 2.0, %v28_v7  ;;  %v41_v11 = vadd.f32 %v32_v5, %v28_v7 }
  0x77   :  { %v43_v13 = vsel %vm107_vm0, %v39_v10, %v41_v11 }
  0x78   :  { %v45_v15 = vsel %vm111_vm1, %v36_v8, %v43_v13  ;;  %v34_v16 = vpop.permute.xlu1 %33  ;;  %v30_v17 = vpop.permute.xlu0 %29 }
  0x79   :  { %v37_v19 = vmul.f32 2.0, %v34_v16  ;;  %v40_v20 = vmul.f32 2.0, %v30_v17  ;;  %v42_v21 = vadd.f32 %v34_v16, %v30_v17  ;;  %v49_v22 = vadd.f32 %v47_v12, %v45_v15 }
  0x7b   :  { %v44_v23 = vsel %vm107_vm0, %v40_v20, %v42_v21  ;;  %v51_v27 = vrot.slane %v49_v22, 7  ;;  %v56_v28 = vrot.slane %v49_v22, 1  ;;  %v75_v39 = vmul.f32 2.0, %v49_v22 }
  0x7c   :  { %v46_v25 = vsel %vm111_vm1, %v37_v19, %v44_v23 }
  0x7d   :  { %v50_v26 = vadd.f32 %v48_v18, %v46_v25 }
  0x7f   :  { %v52_v29 = vrot.slane %v50_v26, 7  ;;  %v57_v30 = vrot.slane %v50_v26, 1  ;;  %v76_v40 = vmul.f32 2.0, %v50_v26 }
  0x81   :  { %v54_v31 = vsel %vm53_vm2, %v51_v27, %v52_v29  ;;  %v55_v32 = vsel %vm53_vm2, %v52_v29, %v51_v27  ;;  %v59_v33 = vsel %vm58_vm3, %v56_v28, %v57_v30  ;;  %v60_v34 = vsel %vm58_vm3, %v57_v30, %v56_v28 }
  0x82   :  { %v63_v35 = vmul.f32 2.0, %v59_v33  ;;  %v68_v36 = vmul.f32 2.0, %v54_v31  ;;  %v69_v37 = vadd.f32 %v59_v33, %v55_v32  ;;  %v70_v38 = vadd.f32 %v60_v34, %v54_v31 }
  0x84   :  { %v72_v41 = vsel %vm66_vm5, %v68_v36, %v70_v38  ;;  %v73_v42 = vsel %vm61_vm4, %v63_v35, %v69_v37 }
  0x85   :  { %v77_v43 = vadd.f32 %v75_v39, %v73_v42  ;;  %v78_v44 = vadd.f32 %v76_v40, %v72_v41 }
  0x87   :  { %v79_v45 = vmul.f32 0.0625, %v77_v43  ;;  %v80_v46 = vmul.f32 0.0625, %v78_v44 }
  0x89   :  { %81 = vst [vmem:[%s130_s1] sm:$0xff] %v79_v45  ;;  %82 = vst [vmem:[%s130_s1 + $0x8] sm:$0xff] %v80_v46 }

</bundles_post_ra>
